<compile_context>
chip_gen: v5e
topology: v5e:2x2
jax: 0.10.0
libtpu: 0.0.40
codegen_flags: <defaults>
</compile_context>

<pallas_src>
import functools

import jax
import jax.numpy as jnp
from jax.experimental import pallas as pl
from jax.experimental.pallas import tpu as pltpu


def _round_up(n, m):
    return ((n + m - 1) // m) * m


# --------------------------------------------------------------------------- #
# Kernel: one fused affine layer + upper_softmax over the class axis.
# --------------------------------------------------------------------------- #
def _fused_kernel(x_ref, w_ref, b_ref, o_ref, *, num_classes):
    # MXU matmul with f32 accumulation (inputs may be bf16).
    z = jnp.dot(x_ref[...], w_ref[...], preferred_element_type=jnp.float32)
    z = z + b_ref[...]                              # bias is f32, (1, Cp) broadcast

    # upper_softmax over the feature axis.  The full (padded) class axis lives in
    # this block; padded classes carry bias = -1e30 so exp(...) == 0 for them.
    # All softmax / threshold math stays in f32 (v5e has no bf16 VPU/EUP path).
    m = jnp.max(z, axis=1, keepdims=True)
    e = jnp.exp(z - m)
    denom = jnp.sum(e, axis=1, keepdims=True)
    s = e * pl.reciprocal(denom, approx=True)       # EUP vrcp — free slot

    thr = jnp.float32(1.0 / num_classes)            # true (unpadded) class count
    o_ref[...] = jnp.where(s >= thr, jnp.float32(1.0), s).astype(o_ref.dtype)


# --------------------------------------------------------------------------- #
# One-time setup: fuse the 4 affine layers (exact: no nonlinearity between them),
# pad the class dim to a lane-dense multiple of 128, cast weights to matmul dtype.
# --------------------------------------------------------------------------- #
def fuse_and_pad_params(params, matmul_dtype=jnp.bfloat16):
    (w1, b1), (w2, b2), (w3, b3), (w4, b4) = params

    # Fuse in f32 (do not compound bf16 rounding through the composition).
    w_f = w1 @ w2 @ w3 @ w4                                   # (latent, C)
    b_f = ((b1 @ w2 + b2) @ w3 + b3) @ w4 + b4                # (1, C)
    C = w_f.shape[1]

    Cp = max(128, _round_up(C, 128))
    if Cp != C:
        w_f = jnp.pad(w_f, ((0, 0), (0, Cp - C)))
        # very negative bias (kept in f32) -> padded classes never win the threshold
        b_f = jnp.pad(b_f, ((0, 0), (0, Cp - C)), constant_values=-1e30)

    return w_f.astype(matmul_dtype), b_f.astype(jnp.float32), C


# --------------------------------------------------------------------------- #
# Generation-aware tile / VMEM-limit selection.
# --------------------------------------------------------------------------- #
def _tpu_meta():
    """Return (physical VMEM bytes per core, tensorcores per chip)."""
    vmem = 128 * 1024 * 1024
    num_tc = 1
    try:
        kind = jax.devices()[0].device_kind.lower()
    except Exception:
        kind = ""
    if "v7" in kind:
        vmem = 64 * 1024 * 1024     # v7x: 64 MiB per TC
        num_tc = 2                  # 2 TCs -> keep >= 2 grid steps
    return vmem, num_tc


def _pick_tile_and_vmem(B, latent, Cp, in_bytes, out_bytes, block_b):
    vmem_phys, num_tc = _tpu_meta()
    budget = int(vmem_phys * 0.6)   # headroom for compiler scratch / spills

    # Resident cost (fused W + bias, double-buffered by the BlockSpec pipeline).
    fixed = 2 * latent * Cp * in_bytes + 2 * Cp * 4
    # Per batch-row cost: x tile + out tile (double-buffered) + f32 intermediates.
    per_row = 2 * latent * in_bytes + 2 * Cp * out_bytes + 3 * Cp * 4

    tm_cap = max(8, ((budget - fixed) // max(per_row, 1)) // 8 * 8)
    tm = min(block_b, _round_up(B, 8), tm_cap)
    if num_tc > 1:
        # Guarantee >= num_tc grid steps so both TensorCores get work.
        tm = min(tm, max(8, _round_up(-(-B // num_tc), 8)))
    tm = max(tm, 8)

    needed = fixed + tm * per_row
    vmem_limit = int(min(vmem_phys - (4 << 20),
                         max(needed + (8 << 20), 32 << 20)))
    return tm, vmem_limit


# --------------------------------------------------------------------------- #
# Forward wrapper (jitted; tile selection happens once per shape at trace time).
# --------------------------------------------------------------------------- #
@functools.partial(jax.jit, static_argnames=("num_classes", "block_b", "out_dtype"))
def generator_upper_softmax(x, w_f, b_f, *, num_classes, block_b=512,
                            out_dtype=jnp.float32):
    """x: (B, latent) f32/bf16. w_f: (latent, Cp) matmul dtype. b_f: (1, Cp) f32."""
    B, latent = x.shape
    Cp = w_f.shape[1]
    in_bytes = jnp.dtype(w_f.dtype).itemsize
    out_bytes = jnp.dtype(out_dtype).itemsize

    tm, vmem_limit = _pick_tile_and_vmem(B, latent, Cp, in_bytes, out_bytes, block_b)
    Bp = _round_up(B, tm)

    xp = x.astype(w_f.dtype)                  # cast activations to the matmul dtype
    if Bp != B:
        xp = jnp.pad(xp, ((0, Bp - B), (0, 0)))
    grid = (Bp // tm,)

    kernel = functools.partial(_fused_kernel, num_classes=num_classes)

    out = pl.pallas_call(
        kernel,
        out_shape=jax.ShapeDtypeStruct((Bp, Cp), out_dtype),
        grid=grid,
        in_specs=[
            pl.BlockSpec((tm, latent), lambda i: (i, 0)),   # x tile, double-buffered
            pl.BlockSpec((latent, Cp), lambda i: (0, 0)),   # fused W, VMEM-resident
            pl.BlockSpec((1, Cp), lambda i: (0, 0)),        # fused b (f32), resident
        ],
        out_specs=pl.BlockSpec((tm, Cp), lambda i: (i, 0)),
        compiler_params=pltpu.CompilerParams(
            dimension_semantics=("parallel",),              # megacore split on v7x
            vmem_limit_bytes=vmem_limit),
        cost_estimate=pl.CostEstimate(
            flops=2 * Bp * latent * Cp,
            transcendentals=Bp * Cp,
            bytes_accessed=(Bp * latent * in_bytes + latent * Cp * in_bytes
                            + Cp * 4 + Bp * Cp * out_bytes)),
    )(xp, w_f, b_f)

    return out[:B, :num_classes]


# --------------------------------------------------------------------------- #
# Parameter init + pure-JAX reference (sequential, unfused).
# --------------------------------------------------------------------------- #
def init_params(key, latent_size, img_size):
    """PyTorch Linear-style U(-1/sqrt(in), 1/sqrt(in)).  W stored as (in, out)."""
    dims = [latent_size, 2 * latent_size, 4 * latent_size, 8 * latent_size, img_size]
    params = []
    for i in range(4):
        fan_in, fan_out = dims[i], dims[i + 1]
        key, kw, kb = jax.random.split(key, 3)
        bound = 1.0 / (fan_in ** 0.5)
        w = jax.random.uniform(kw, (fan_in, fan_out), jnp.float32, -bound, bound)
        b = jax.random.uniform(kb, (1, fan_out), jnp.float32, -bound, bound)
        params.append((w, b))
    return params


def reference_forward(x, params):
    h = x
    for (w, b) in params:
        h = h @ w + b
    s = jax.nn.softmax(h, axis=1)
    thr = 1.0 / h.shape[1]
    return jnp.where(s >= thr, 1.0, s), s


if __name__ == "__main__":
    latent_size = 32
    img_size = 128
    batch = 20          # not a multiple of the tile -> exercises pad + multi-step grid

    key = jax.random.PRNGKey(0)
    key, kx = jax.random.split(key)
    x = jax.random.normal(kx, (batch, latent_size), jnp.float32)
    params = init_params(key, latent_size, img_size)

    # --- production configuration: bf16 matmul inputs, small tiles to force a grid ---
    w_bf, b_bf, C = fuse_and_pad_params(params, matmul_dtype=jnp.bfloat16)
    out_bf = generator_upper_softmax(x, w_bf, b_bf, num_classes=C, block_b=8)
    out_bf = jax.block_until_ready(out_bf)
    assert out_bf.shape == (batch, img_size)
    assert bool(jnp.all(jnp.isfinite(out_bf)))
    assert bool(jnp.all((out_bf >= 0.0) & (out_bf <= 1.0)))

    # --- f32 configuration: strict check against the unfused sequential reference ---
    w_f32, b_f32, C = fuse_and_pad_params(params, matmul_dtype=jnp.float32)
    out = generator_upper_softmax(x, w_f32, b_f32, num_classes=C, block_b=8)
    out = jax.block_until_ready(out)

    ref, s_ref = reference_forward(x, params)
    assert out.shape == (batch, img_size)

    # The hard threshold at s == 1/C is legitimately fp-rounding sensitive (fused
    # weights / approx reciprocal shift s by ~1e-6), so elements essentially on the
    # threshold are checked loosely; everything else must match tightly.
    thr = 1.0 / img_size
    near_thr = jnp.abs(s_ref - thr) < 1e-4
    strict_ok = jnp.isclose(out, ref, atol=1e-4, rtol=1e-3)
    near_ok = jnp.isclose(out, 1.0, atol=1e-3) | (jnp.abs(out - thr) < 2e-4)
    assert bool(jnp.all(jnp.where(near_thr, near_ok, strict_ok))), "mismatch vs reference"

    print("KERNEL_OK")
</pallas_src>

<mosaic_0001>
module attributes {stable_mosaic.version = 11 : i64} {
  func.func @_fused_kernel(%arg0: i32, %arg1: memref<8x32xbf16, #tpu.memory_space<vmem>>, %arg2: memref<32x128xbf16, #tpu.memory_space<vmem>>, %arg3: memref<1x128xf32, #tpu.memory_space<vmem>>, %arg4: memref<8x128xf32, #tpu.memory_space<vmem>>) attributes {dimension_semantics = [#tpu.dimension_semantics<parallel>], iteration_bounds = array<i64: 3>, scalar_prefetch = 0 : i64, scratch_operands = 0 : i64, tpu.core_type = #tpu.core_type<tc>, window_params = [{transform_indices = @transform_0, window_bounds = array<i64: 8, 32>}, {pipeline_mode = #tpu.pipeline_mode<synchronous>, transform_indices = @transform_1, window_bounds = array<i64: 32, 128>}, {pipeline_mode = #tpu.pipeline_mode<synchronous>, transform_indices = @transform_2, window_bounds = array<i64: 1, 128>}, {transform_indices = @transform_3, window_bounds = array<i64: 8, 128>}]} {
    %c0 = arith.constant 0 : index
    %c0_0 = arith.constant 0 : index
    %0 = vector.load %arg1[%c0, %c0_0] : memref<8x32xbf16, #tpu.memory_space<vmem>>, vector<8x32xbf16>
    %c0_1 = arith.constant 0 : index
    %c0_2 = arith.constant 0 : index
    %1 = vector.load %arg2[%c0_1, %c0_2] : memref<32x128xbf16, #tpu.memory_space<vmem>>, vector<32x128xbf16>
    %cst = arith.constant dense<0.000000e+00> : vector<8x128xf32>
    %2 = tpu.matmul %0, %1, %cst {dimension_numbers = #tpu.dot_dimension_numbers<[1], [0], [0], [1], [0, 0, 1, 1], [], []>} : vector<8x32xbf16>, vector<32x128xbf16>, vector<8x128xf32> -> vector<8x128xf32>
    %c0_3 = arith.constant 0 : index
    %c0_4 = arith.constant 0 : index
    %3 = vector.load %arg3[%c0_3, %c0_4] : memref<1x128xf32, #tpu.memory_space<vmem>>, vector<1x128xf32>
    %4 = vector.broadcast %3 : vector<1x128xf32> to vector<8x128xf32>
    %5 = arith.addf %2, %4 : vector<8x128xf32>
    %cst_5 = arith.constant dense<0xFF800000> : vector<8xf32>
    %6 = vector.multi_reduction <maximumf>, %5, %cst_5 [1] : vector<8x128xf32> to vector<8xf32>
    %7 = vector.shape_cast %6 : vector<8xf32> to vector<8x1xf32>
    %8 = vector.broadcast %7 : vector<8x1xf32> to vector<8x128xf32>
    %9 = arith.subf %5, %8 : vector<8x128xf32>
    %10 = math.exp %9 : vector<8x128xf32>
    %cst_6 = arith.constant dense<0.000000e+00> : vector<8xf32>
    %11 = vector.multi_reduction <add>, %10, %cst_6 [1] : vector<8x128xf32> to vector<8xf32>
    %12 = vector.shape_cast %11 : vector<8xf32> to vector<8x1xf32>
    %13 = tpu.reciprocal %12 {approx = true} : vector<8x1xf32> -> vector<8x1xf32>
    %14 = vector.broadcast %13 : vector<8x1xf32> to vector<8x128xf32>
    %15 = arith.mulf %10, %14 : vector<8x128xf32>
    %cst_7 = arith.constant 7.812500e-03 : f32
    %16 = vector.broadcast %cst_7 : f32 to vector<8x128xf32>
    %17 = arith.cmpf oge, %15, %16 : vector<8x128xf32>
    %cst_8 = arith.constant 1.000000e+00 : f32
    %18 = vector.broadcast %cst_8 : f32 to vector<8x128xf32>
    %19 = arith.select %17, %18, %15 : vector<8x128xi1>, vector<8x128xf32>
    %c0_9 = arith.constant 0 : index
    %c0_10 = arith.constant 0 : index
    %20 = vector.load %arg4[%c0_9, %c0_10] : memref<8x128xf32, #tpu.memory_space<vmem>>, vector<8x128xf32>
    tpu.vector_store %arg4[%c0_9, %c0_10], %19 {strides = array<i32>} : memref<8x128xf32, #tpu.memory_space<vmem>>, vector<8x128xf32>,
    return
  }
  func.func @transform_0(%arg0: i32) -> (i32, i32) {
    %c0_i32 = arith.constant 0 : i32
    %c0_i32_0 = arith.constant 0 : i32
    return %arg0, %c0_i32 : i32, i32
  }
  func.func @transform_1(%arg0: i32) -> (i32, i32) {
    %c0_i32 = arith.constant 0 : i32
    %c0_i32_0 = arith.constant 0 : i32
    %c0_i32_1 = arith.constant 0 : i32
    return %c0_i32, %c0_i32_0 : i32, i32
  }
  func.func @transform_2(%arg0: i32) -> (i32, i32) {
    %c0_i32 = arith.constant 0 : i32
    %c0_i32_0 = arith.constant 0 : i32
    %c0_i32_1 = arith.constant 0 : i32
    return %c0_i32, %c0_i32_0 : i32, i32
  }
  func.func @transform_3(%arg0: i32) -> (i32, i32) {
    %c0_i32 = arith.constant 0 : i32
    %c0_i32_0 = arith.constant 0 : i32
    return %arg0, %c0_i32 : i32, i32
  }
}

</mosaic_0001>

<bundles_post_ra>
// kernel: generator_upper_softmax.1
= control target key start
LH: loop header
LB: loop body
LE: loop exit
PB: predicated region body
PF: predicated region fallthrough
CT: control target
= control target key end

     0   :  { %8 = vsyncpa [#allocation3], 0  ;;  %s535_s0 = inlined_call_operand.vmem [shape: bf16[24,32], index: 0, kind: input, shape index: {}]   ;;  %s536_s1 = inlined_call_operand.vmem [shape: bf16[32,128], index: 1, kind: input, shape index: {}]   ;;  %s537_s2 = inlined_call_operand.vmem [shape: f32[1,128], index: 2, kind: input, shape index: {}]   ;;  %s538_s3 = inlined_call_operand.hbm [shape: f32[24,128], index: 3, kind: output, shape index: {}]  }
   0x1   :  { %10 = vsyncpa [#allocation3 + $0x1], 0  ;;  %s441_s12 = smov 0   ;;  %s443_s13 = smov 0  }
   0x2   :  { %s445_s14 = smov 0   ;;  %s447_s15 = smov 0  }
   0x3 LB: > { %s462_s16 = sadd.s32 4294967295, %s419_s15   ;;  %s292_s17 = sadd.s32 4294967294, %s419_s15   ;;  %s419_s15 = sphi %s447_s15, %s544_s15   ;;  %s415_s14 = sphi %s445_s14, %s543_s14   ;;  %s411_s13 = sphi %s443_s13, %s542_s13   ;;  %s407_s12 = sphi %s441_s12, %s541_s12  }
   0x4   : > { %s466_s18 = sadd.s32 1, %s419_s15   ;;  %s91_s19 = sadd.s32 1, %s415_s14 }
   0x5   : > { %s88_s20 = ssub.s32 %s419_s15, %s466_s18  ;;  %p101_p0 = scmp.ne.s32.totalorder %s415_s14, %s411_s13 }
   0x6   : > { %p89_p1 = scmp.eq.s32.totalorder %s88_s20, 0  ;;  %p102_p2 = scmp.eq.s32.totalorder %s462_s16, 2 }
   0x7   : > { %p107_p3 = scmp.ne.s32.totalorder %s411_s13, %s407_s12  ;;  %p108_p4 = scmp.eq.s32.totalorder %s292_s17, 2 }
   0x8   : > { %s477_s21 = scalar_select %p89_p1, %s415_s14, %s91_s19  }
   0x9   : > { %p479_p5 = por %p102_p2, %p101_p0  ;;  %p483_p6 = por %p108_p4, %p107_p3 }
   0xa   : > { %p295_p7 = scmp.ge.s32.totalorder %s419_s15, 1  ;;  %p139_p8 = scmp.lt.s32.totalorder %s419_s15, 4 }
   0xc   : > { %p140_p9 = pnand %p295_p7, %p139_p8 }
   0xd   : > { %p162_p10 = scmp.lt.s32.totalorder (!%p140_p9), %s462_s16, 2  ;;  %s159_s8 = sand.u32 (!%p140_p9), 1, %s411_s13  }
   0xe   : > { %143 = sbr.rel (%p140_p9) target bundleno = 412 (0x19c), region = 32  ;;  %s296_s9 = sshll.u32 (!%p140_p9), %s159_s8, 3 }
   0xf   : > { %s308_s10 = sshll.u32 (!%p140_p9), %s462_s16, 3  ;;  %s161_s20 = scalar_lea.vmem (!%p140_p9), [#allocation2], %s296_s9 }
  0x10   : > { %s228_s19 = scalar_lea.hbm (!%p140_p9), %s538_s3, %s308_s10  ;;  %s230_s24 = sshll.u32 (!%p140_p9), %s161_s20, 4  ;;  %s231_s24 = int_to_ptr.vmem [resolvable:$true] %s230_s24 }
  0x11   : > { %s232_s25 = sshll.u32 (!%p140_p9), %s228_s19, 4  ;;  %s218_s26 = scalar_lea.sflag (!%p140_p9), [#allocation3], %s159_s8  ;;  %s233_s25 = int_to_ptr.hbm [resolvable:$true] %s232_s25 }
  0x12   : > { %s371_s27 = sshra.s32 (!%p140_p9), %s233_s25, 4  ;;  %s377_s30 = scalar_lea.hbm (!%p140_p9), %s538_s3, 24  ;;  %s372_s27 = int_to_ptr.hbm [resolvable:$true] %s371_s27 }
  0x13   : > { %v312_v0 = vld [vmem:[%s536_s1 + $0x8] sm:$0xff]  ;;  %v311_v1 = vld [vmem:[%s536_s1] sm:$0xff]  ;;  %s163_s28 = scalar_select %p162_p10, %s462_s16, 2  ;;  %vm188_vm0 = vcmask 261120  }
  0x14   : > { %198 = vmatpush.bf16.msra.mxu0 %v312_v0  ;;  %v352_v3 = vld [vmem:[%s537_s2] ss:$0 sm:$0xff]  ;;  %p378_p0 = scmp.lt.s32.totalorder %s372_s27, %s538_s3 }
  0x15   : > { %s297_s29 = sshll.u32 %s163_s28, 2  ;;  %s373_s28 = scalar_lea.hbm %s372_s27, 8 }
  0x16   : > { %s165_s5 = scalar_lea.vmem %s535_s0, %s297_s29  ;;  %p374_p11 = scmp.ne.s32.totalorder %s372_s27, %s373_s28 }
  0x17   : > { %v167_v2 = vld [vmem:[%s165_s5] sm:$0xf]  ;;  %p379_p1 = scmp.lt.s32.totalorder %s377_s30, %s373_s28 }
  0x18   : > { %199 = vmatpush.bf16.msra.mxu0 %v311_v1  ;;  %p375_p12 = pnand %p374_p11, %p479_p5 }
  0x19   : > { %p380_p2 = por %p379_p1, %p378_p0 }
  0x1a   : > { %p376_p13 = pneg %p375_p12 }
  0x1b   : > { %306 = vmatmul.msk.bf16.vlgmr.msra.gmra.mxu0 %vm188_vm0, %v167_v2 }
  0x1c   : > { %p381_p3 = pnand %p380_p2, %p376_p13 }
  0x98   : > { %v201_v4 = vpop.f32.mrf.mxu0 }
  0x99   : > { %v202_v5 = vadd.f32 %v352_v3, %v201_v4 }
  0x9b   : > { %205 = vmax.xlane.f32.xlu0 %v202_v5 }
  0xa0   : > { %v203_v6 = vpop.f32.mrf.mxu0 }
 0x10e   : > { %v206_v7 = vpop.xlane.xlu0 %205 }
 0x10f   : > { %v207_v8 = vsub.f32 %v202_v5, %v206_v7 }
 0x111   : > { %v208_v9 = vmul.f32 1.442695, %v207_v8 }
 0x113   : > { %353 = vpow2.f32 %v208_v9 }
 0x119   : > { %v354_v10 = vpop.eup %353 }
 0x11a   : > { %210 = vadd.xlane.f32.xlu0 %v354_v10 }
 0x18d   : > { %v211_v11 = vpop.xlane.xlu0 %210 }
 0x18e   : > { %355 = vrcp.f32 %v211_v11 }
 0x194   : > { %v356_v12 = vpop.eup %355 }
 0x195   : > { %v213_v13 = vmul.f32 %v356_v12, %v354_v10 }
 0x197   : > { %vm214_vm1 = vcmp.ge.f32.partialorder %v213_v13, 0.0078125 }
 0x198   : > { %v215_v14 = vsel %vm214_vm1, 1.0, %v213_v13 }
 0x199   : > { %216 = vst [vmem:[%s161_s20] sm:$0xff] %v215_v14 }
 0x19a   : > { %384 = shalt.err (!%p381_p3)
}
 0x19b   : > { %313 = dma.vmem_to_hbm [thread:$0]  (%p479_p5), %s231_s24, 128, %s233_s25, %s218_s26  }
 0x19c PF: > { %p319_p4 = scmp.ge.s32.totalorder %s419_s15, 2  ;;  %s244_s6 = sand.u32 1, %s407_s12  }
 0x19d   : > { %s245_s7 = scalar_lea.sflag [#allocation3], %s244_s6 }
 0x19e   : > { %p316_p7 = pnand %p319_p4, %p483_p6 }
 0x1a0   : > { %p317_p8 = pneg %p316_p7 }
 0x1a2   : > { %402 = dma.done.wait (%p317_p8), %s245_s7, 128  }
 0x1a3   : > { %404 = vsyncadd (%p317_p8), %s245_s7, 4294967168  ;;  %p13_p9 = scmp.ge.s32.totalorder %s466_s18, 5   ;;  %s541_s12 = smov %s411_s13 }
 0x1a4   : > { %s542_s13 = smov %s415_s14  ;;  %s543_s14 = smov %s477_s21 }
 0x1a5   : > { %s544_s15 = smov %s466_s18  ;;  %15 = sbr.rel (!%p13_p9) target bundleno = 3 (0x3), region = 67 }
 0x1aa   :  { %251 = vsyncpa [#allocation3], 1 }
 0x1ab   :  { %253 = vsyncpa [#allocation3 + $0x1], 1 }

</bundles_post_ra>
